<compile_context>
chip_gen: v6e
topology: v6e:2x2x1
jax: 0.10.0
libtpu: 0.0.40
codegen_flags: <defaults>
</compile_context>

<pallas_src>
import functools

import jax
import jax.numpy as jnp
from jax.experimental import pallas as pl
from jax.experimental.pallas import tpu as pltpu

_LANES = 128
_TARGET_BLOCK_BYTES = 2 * 1024 * 1024  # ~2 MiB per input block


def _combined_loss_kernel(pred_ref, targ_ref, out_ref, *,
                          tile_rows, valid_rows, needs_mask):
    # Upcast per tile (keeps HBM traffic at the input dtype width, e.g. bf16;
    # v5e has no bf16 VALU so cast immediately after load).
    p = pred_ref[...].astype(jnp.float32)
    t = targ_ref[...].astype(jnp.float32)
    d = p - t
    ad = jnp.abs(d)
    sq = d * d
    # Fused weighted per-element loss:
    #   0.4*sq + 0.3*ad + 0.3*huber, huber = 0.5*sq if ad < 1 else ad - 0.5
    # = base + where(ad < 1, 0.15*sq, 0.3*ad - 0.15),  base = 0.4*sq + 0.3*ad
    # (reuses the 0.3*ad product in both branches).
    mae_t = 0.3 * ad
    w = 0.4 * sq + mae_t + jnp.where(ad < 1.0, 0.15 * sq, mae_t - 0.15)

    def reduce_to_vreg(x):
        # (tile_rows, 128) -> (tile_rows//8, 8, 128), sum over the leading
        # vreg-row groups: pure VALU vreg adds, no cross-lane XLU work, and the
        # (8,128) result stores unmasked into the aligned output block.
        return jnp.sum(x.reshape(tile_rows // 8, 8, _LANES), axis=0)

    if needs_mask:
        last = pl.num_programs(0) - 1

        @pl.when(pl.program_id(0) == last)
        def _():
            # Only the last grid block can extend past the valid rows (Pallas
            # pads its window with unspecified data); zero those rows before
            # the reduction. select() does not propagate NaN/Inf from the
            # unselected (garbage) lanes.
            row = (jax.lax.broadcasted_iota(jnp.int32, w.shape, 0)
                   + pl.program_id(0) * tile_rows)
            out_ref[...] = reduce_to_vreg(jnp.where(row < valid_rows, w, 0.0))

        @pl.when(pl.program_id(0) != last)
        def _():
            out_ref[...] = reduce_to_vreg(w)
    else:
        out_ref[...] = reduce_to_vreg(w)


def combined_loss(pred, target, *, tile_rows=None):
    assert pred.shape == target.shape
    n = pred.size
    pf = pred.reshape(-1)
    tf = target.reshape(-1)

    # Lane-dense 2-D view. Pad the flat length up to a multiple of 128 lanes
    # (and to at least 8 sublane rows) only when needed; zero padding
    # contributes exactly 0 to the fused weighted sum (d == 0) and the mean
    # divides by the true n.
    # TODO(synk): for large n with n % 128 != 0 this pad is a full HBM copy; a
    # copy-free path would need 1-D blocks + an in-kernel flat-index mask.
    padded = max(8 * _LANES, -(-n // _LANES) * _LANES)
    if padded != n:
        pf = jnp.pad(pf, (0, padded - n))
        tf = jnp.pad(tf, (0, padded - n))

    rows = padded // _LANES
    pf = pf.reshape(rows, _LANES)
    tf = tf.reshape(rows, _LANES)

    itemsize = jnp.dtype(pf.dtype).itemsize
    if tile_rows is None:
        # ~2 MiB per input block: 4096 rows for f32, 8192 rows for bf16.
        # Per-step VMEM = 2 inputs x 2 pipeline buffers x block -> ~8 MiB,
        # inside the v5e 16 MiB scoped-VMEM default with headroom.
        tile_rows = _TARGET_BLOCK_BYTES // (_LANES * itemsize)
    # Keep the block within the array extent and 8-aligned on the sublane dim.
    tile_rows = min(tile_rows, rows)
    # v7x has 2 TensorCores: make sure the "parallel" grid axis has >= 2 blocks
    # whenever the row extent allows, so both cores stream and compute.
    half8 = (-(-rows // 2) + 7) // 8 * 8
    if half8 < rows:
        tile_rows = min(tile_rows, half8)
    tile_rows = max(8, (tile_rows // 8) * 8)

    num_blocks = -(-rows // tile_rows)
    needs_mask = (num_blocks * tile_rows) != rows

    cost = pl.CostEstimate(
        flops=11 * n,
        transcendentals=0,
        bytes_accessed=2 * padded * itemsize + num_blocks * 8 * _LANES * 4,
    )

    partials = pl.pallas_call(
        functools.partial(
            _combined_loss_kernel,
            tile_rows=tile_rows,
            valid_rows=rows,
            needs_mask=needs_mask,
        ),
        out_shape=jax.ShapeDtypeStruct((num_blocks * 8, _LANES), jnp.float32),
        grid_spec=pltpu.PrefetchScalarGridSpec(
            num_scalar_prefetch=0,
            grid=(num_blocks,),
            in_specs=[
                pl.BlockSpec((tile_rows, _LANES), lambda i: (i, 0)),
                pl.BlockSpec((tile_rows, _LANES), lambda i: (i, 0)),
            ],
            out_specs=pl.BlockSpec((8, _LANES), lambda i: (i, 0)),
        ),
        compiler_params=pltpu.CompilerParams(
            dimension_semantics=("parallel",),  # independent partial sums
        ),
        cost_estimate=cost,
    )(pf, tf)

    # Tiny final reduction over (num_blocks*8, 128) partials; weights are
    # already folded in, so the weighted mean is just sum / n.
    return jnp.sum(partials) / jnp.float32(n)


def _reference(pred, target):
    d = pred.astype(jnp.float32) - target.astype(jnp.float32)
    ad = jnp.abs(d)
    mse = jnp.mean(d * d)
    mae = jnp.mean(ad)
    hub = jnp.mean(jnp.where(ad < 1.0, 0.5 * d * d, ad - 0.5))
    return 0.4 * mse + 0.3 * mae + 0.3 * hub


if __name__ == "__main__":
    key = jax.random.PRNGKey(0)
    kp, kt = jax.random.split(key)
    # Small NCHW-shaped pred/target, consistent with a regression loss module.
    pred = jax.random.normal(kp, (2, 4, 16, 16), dtype=jnp.float32)
    target = jax.random.normal(kt, (2, 4, 16, 16), dtype=jnp.float32)

    loss = combined_loss(pred, target)
    jax.block_until_ready(loss)

    ref = _reference(pred, target)
    assert jnp.allclose(loss, ref, rtol=1e-5, atol=1e-5), (loss, ref)
    print("KERNEL_OK")
</pallas_src>

<mosaic_0001>
module attributes {stable_mosaic.version = 11 : i64} {
  func.func @_combined_loss_kernel(%arg0: i32, %arg1: memref<8x128xf32, #tpu.memory_space<vmem>>, %arg2: memref<8x128xf32, #tpu.memory_space<vmem>>, %arg3: memref<8x128xf32, #tpu.memory_space<vmem>>) attributes {dimension_semantics = [#tpu.dimension_semantics<parallel>], iteration_bounds = array<i64: 2>, scalar_prefetch = 0 : i64, scratch_operands = 0 : i64, tpu.core_type = #tpu.core_type<tc>, window_params = [{transform_indices = @transform_0, window_bounds = array<i64: 8, 128>}, {transform_indices = @transform_1, window_bounds = array<i64: 8, 128>}, {transform_indices = @transform_2, window_bounds = array<i64: 8, 128>}]} {
    %c0 = arith.constant 0 : index
    %c0_0 = arith.constant 0 : index
    %0 = vector.load %arg1[%c0, %c0_0] : memref<8x128xf32, #tpu.memory_space<vmem>>, vector<8x128xf32>
    %c0_1 = arith.constant 0 : index
    %c0_2 = arith.constant 0 : index
    %1 = vector.load %arg2[%c0_1, %c0_2] : memref<8x128xf32, #tpu.memory_space<vmem>>, vector<8x128xf32>
    %2 = arith.subf %0, %1 : vector<8x128xf32>
    %3 = math.absf %2 : vector<8x128xf32>
    %4 = arith.mulf %2, %2 : vector<8x128xf32>
    %cst = arith.constant 3.000000e-01 : f32
    %5 = vector.broadcast %cst : f32 to vector<8x128xf32>
    %6 = arith.mulf %5, %3 : vector<8x128xf32>
    %cst_3 = arith.constant 4.000000e-01 : f32
    %7 = vector.broadcast %cst_3 : f32 to vector<8x128xf32>
    %8 = arith.mulf %7, %4 : vector<8x128xf32>
    %9 = arith.addf %8, %6 : vector<8x128xf32>
    %cst_4 = arith.constant 1.000000e+00 : f32
    %10 = vector.broadcast %cst_4 : f32 to vector<8x128xf32>
    %11 = arith.cmpf olt, %3, %10 : vector<8x128xf32>
    %cst_5 = arith.constant 1.500000e-01 : f32
    %12 = vector.broadcast %cst_5 : f32 to vector<8x128xf32>
    %13 = arith.mulf %12, %4 : vector<8x128xf32>
    %cst_6 = arith.constant 1.500000e-01 : f32
    %14 = vector.broadcast %cst_6 : f32 to vector<8x128xf32>
    %15 = arith.subf %6, %14 : vector<8x128xf32>
    %16 = arith.select %11, %13, %15 : vector<8x128xi1>, vector<8x128xf32>
    %17 = arith.addf %9, %16 : vector<8x128xf32>
    %18 = vector.shape_cast %17 : vector<8x128xf32> to vector<1x8x128xf32>
    %cst_7 = arith.constant dense<0.000000e+00> : vector<8x128xf32>
    %19 = vector.multi_reduction <add>, %18, %cst_7 [0] : vector<1x8x128xf32> to vector<8x128xf32>
    %c0_8 = arith.constant 0 : index
    %c0_9 = arith.constant 0 : index
    %20 = vector.load %arg3[%c0_8, %c0_9] : memref<8x128xf32, #tpu.memory_space<vmem>>, vector<8x128xf32>
    tpu.vector_store %arg3[%c0_8, %c0_9], %19 {strides = array<i32>} : memref<8x128xf32, #tpu.memory_space<vmem>>, vector<8x128xf32>,
    return
  }
  func.func @transform_0(%arg0: i32) -> (i32, i32) {
    %c0_i32 = arith.constant 0 : i32
    %c0_i32_0 = arith.constant 0 : i32
    return %arg0, %c0_i32 : i32, i32
  }
  func.func @transform_1(%arg0: i32) -> (i32, i32) {
    %c0_i32 = arith.constant 0 : i32
    %c0_i32_0 = arith.constant 0 : i32
    return %arg0, %c0_i32 : i32, i32
  }
  func.func @transform_2(%arg0: i32) -> (i32, i32) {
    %c0_i32 = arith.constant 0 : i32
    %c0_i32_0 = arith.constant 0 : i32
    return %arg0, %c0_i32 : i32, i32
  }
}

</mosaic_0001>

<bundles_post_ra>
// kernel: tpu_custom_call.1
= control target key start
LH: loop header
LB: loop body
LE: loop exit
PB: predicated region body
PF: predicated region fallthrough
CT: control target
= control target key end

     0   :  { %7 = vsyncpa [#allocation3], 0  ;;  %s723_s0 = inlined_call_operand.hbm [shape: f32[16,128], index: 0, kind: input, shape index: {}]   ;;  %s724_s1 = inlined_call_operand.hbm [shape: f32[16,128], index: 1, kind: input, shape index: {}]   ;;  %s725_s2 = inlined_call_operand.hbm [shape: f32[16,128], index: 2, kind: output, shape index: {}]  }
   0x1   :  { %9 = vsyncpa [#allocation3 + $0x1], 0 }
   0x2   :  { %10 = vsyncpa [#allocation6], 0 }
   0x3   :  { %12 = vsyncpa [#allocation6 + $0x1], 0 }
   0x4   :  { %13 = vsyncpa [#allocation4], 0 }
   0x5   :  { %15 = vsyncpa [#allocation4 + $0x1], 0  ;;  %s529_s9 = smov 0   ;;  %s531_s10 = smov 0  }
   0x6   :  { %s533_s11 = smov 0   ;;  %s535_s12 = smov 0  }
   0x7 LB: > { %s550_s13 = sadd.s32 4294967295, %s509_s12   ;;  %s318_s14 = sadd.s32 4294967294, %s509_s12   ;;  %s509_s12 = sphi %s535_s12, %s744_s12   ;;  %s505_s11 = sphi %s533_s11, %s743_s11   ;;  %s501_s10 = sphi %s531_s10, %s742_s10   ;;  %s497_s9 = sphi %s529_s9, %s741_s9  }
   0x8   : > { %s554_s15 = sadd.s32 1, %s509_s12   ;;  %s28_s16 = sadd.s32 1, %s505_s11 }
   0x9   : > { %s25_s17 = ssub.s32 %s509_s12, %s554_s15  ;;  %p35_p0 = scmp.ne.s32.totalorder %s505_s11, %s501_s10 }
   0xa   : > { %p26_p1 = scmp.eq.s32.totalorder %s25_s17, 0  ;;  %p36_p2 = scmp.eq.s32.totalorder %s509_s12, 0 }
   0xb   : > { %p41_p3 = scmp.ne.s32.totalorder %s501_s10, %s497_s9  ;;  %p42_p4 = scmp.eq.s32.totalorder %s550_s13, 0 }
   0xc   : > { %s566_s18 = scalar_select %p26_p1, %s505_s11, %s28_s16  }
   0xd   : > { %p568_p5 = por %p36_p2, %p35_p0  ;;  %p572_p6 = por %p42_p4, %p41_p3 }
   0xe   : > { %p91_p7 = scmp.eq.s32.totalorder %s550_s13, 1  ;;  %p97_p8 = scmp.eq.s32.totalorder %s318_s14, 1 }
   0xf   : > { %s729_s20 = scalar_select %p572_p6, 1, 0 }
  0x10   : > { %p351_p10 = scmp.lt.s32.totalorder %s509_s12, 2  ;;  %p579_p11 = por %p91_p7, %p35_p0 }
  0x11   : > { %p583_p12 = por %p97_p8, %p41_p3  ;;  %s588_s23 = sand.u32 1, %s505_s11  }
  0x12   : > { %s730_s21 = scalar_select %p579_p11, 1, 0 }
  0x13   : > { %s731_s22 = scalar_select %p583_p12, 1, 0 }
  0x14   : > { %s322_s24 = sshll.u32 %s509_s12, 7  ;;  %s321_s25 = sshll.u32 %s588_s23, 3 }
  0x15   : > { %s597_s28 = scalar_lea.hbm %s723_s0, %s322_s24  ;;  %s121_s29 = scalar_lea.vmem [#allocation2], %s321_s25 }
  0x16   : > { %s128_s30 = sshll.u32 %s121_s29, 4  ;;  %p603_p13 = pnand %p351_p10, %p568_p5  ;;  %s607_s30 = int_to_ptr.vmem [resolvable:$true] %s128_s30 }
  0x17   : > { %s118_s4 = scalar_lea.sflag [#allocation3], %s588_s23  ;;  %s385_s5 = scalar_lea.hbm %s597_s28, 128 }
  0x18   : > { %p386_p2 = scmp.ne.s32.totalorder %s597_s28, %s385_s5  ;;  %p387_p3 = pneg %p603_p13 }
  0x19   : > { %s390_s8 = scalar_lea.hbm %s723_s0, 256  ;;  %p391_p5 = scmp.lt.s32.totalorder %s597_s28, %s723_s0 }
  0x1a   : > { %p388_p4 = pnand %p387_p3, %p386_p2  ;;  %p392_p8 = scmp.lt.s32.totalorder %s390_s8, %s385_s5 }
  0x1c   : > { %p389_p7 = pneg %p388_p4  ;;  %p393_p10 = por %p392_p8, %p391_p5 }
  0x1e   : > { %p394_p9 = pnand %p393_p10, %p389_p7 }
  0x20   : > { %397 = shalt.err (!%p394_p9)
}
  0x21   : > { %s398_s17 = scalar_lea.vmem %s607_s30, 128  ;;  %s511_s19 = smov [#allocation2]  }
  0x22   : > { %p399_p0 = scmp.ne.s32.totalorder %s607_s30, %s398_s17  ;;  %s403_s26 = sshll.u32 %s511_s19, 4  ;;  %s404_s26 = int_to_ptr.vmem [resolvable:$false] %s403_s26 }
  0x23   : > { %s405_s27 = scalar_lea.vmem %s404_s26, 256  ;;  %p406_p1 = scmp.lt.s32.totalorder %s607_s30, %s404_s26 }
  0x24   : > { %p401_p2 = pnand %p399_p0, %p387_p3  ;;  %p407_p12 = scmp.lt.s32.totalorder %s405_s27, %s398_s17 }
  0x26   : > { %p402_p4 = pneg %p401_p2  ;;  %p408_p11 = por %p407_p12, %p406_p1 }
  0x28   : > { %p409_p5 = pnand %p408_p11, %p402_p4 }
  0x2a   : > { %412 = shalt.err (!%p409_p5)
}
  0x2b   : > { %343 = dma.hbm_to_vmem [thread:$0]  (!%p603_p13), %s597_s28, 128, %s607_s30, %s118_s4  }
  0x2c   : > { %p733_p9 = scmp.lt.s32.totalorder %s509_s12, 3  ;;  %p734_p0 = scmp.ge.s32.totalorder %s509_s12, 1 }
  0x2d   : > { %s649_s7 = scalar_lea.hbm %s724_s1, %s322_s24  ;;  %s139_s8 = scalar_lea.vmem [#allocation5], %s321_s25 }
  0x2e   : > { %p640_p7 = pnand %p734_p0, %p733_p9  ;;  %s146_s14 = sshll.u32 %s139_s8, 4  ;;  %s147_s14 = int_to_ptr.vmem [resolvable:$true] %s146_s14 }
  0x2f   : > { %s136_s28 = scalar_lea.sflag [#allocation6], %s588_s23  ;;  %s413_s30 = scalar_lea.hbm %s649_s7, 128 }
  0x30   : > { %s735_s29 = scalar_select %p640_p7, 1, 0 }
  0x31   : > { %p414_p11 = scmp.ne.s32.totalorder %s649_s7, %s413_s30  ;;  %s418_s17 = scalar_lea.hbm %s724_s1, 256 }
  0x32   : > { %p419_p8 = scmp.lt.s32.totalorder %s649_s7, %s724_s1  ;;  %p420_p10 = scmp.lt.s32.totalorder %s418_s17, %s413_s30 }
  0x33   : > { %p416_p12 = pnand %p414_p11, %p387_p3 }
  0x34   : > { %p421_p2 = por %p420_p10, %p419_p8 }
  0x35   : > { %p417_p1 = pneg %p416_p12 }
  0x37   : > { %p422_p4 = pnand %p421_p2, %p417_p1 }
  0x39   : > { %425 = shalt.err (!%p422_p4)
}
  0x3a   : > { %s426_s25 = scalar_lea.vmem %s147_s14, 128  ;;  %s512_s23 = smov [#allocation5]  }
  0x3b   : > { %p427_p5 = scmp.ne.s32.totalorder %s147_s14, %s426_s25  ;;  %s431_s26 = sshll.u32 %s512_s23, 4  ;;  %s432_s26 = int_to_ptr.vmem [resolvable:$false] %s431_s26 }
  0x3c   : > { %s433_s27 = scalar_lea.vmem %s432_s26, 256  ;;  %p434_p11 = scmp.lt.s32.totalorder %s147_s14, %s432_s26 }
  0x3d   : > { %p429_p9 = pnand %p427_p5, %p387_p3  ;;  %p435_p12 = scmp.lt.s32.totalorder %s433_s27, %s426_s25 }
  0x3f   : > { %p430_p0 = pneg %p429_p9  ;;  %p436_p6 = por %p435_p12, %p434_p11 }
  0x41   : > { %p437_p7 = pnand %p436_p6, %p430_p0 }
  0x43   : > { %440 = shalt.err (!%p437_p7)
}
  0x44   : > { %346 = dma.hbm_to_vmem [thread:$0]  (!%p603_p13), %s649_s7, 128, %s147_s14, %s136_s28  }
  0x45   : > { %p736_p1 = scmp.ne.s32.totalorder %s735_s29, 0 }
  0x46   : > { %s675_s5 = sand.u32 (!%p736_p1), 1, %s501_s10   ;;  %p737_p3 = scmp.ne.s32.totalorder (!%p736_p1), %s729_s20, 0 }
  0x47   : > { %155 = sbr.rel (%p736_p1) target bundleno = 104 (0x68), region = 28  ;;  %s326_s6 = sshll.u32 (!%p736_p1), %s675_s5, 3 }
  0x48   : > { %s158_s8 = scalar_lea.sflag (!%p736_p1), [#allocation3], %s675_s5  ;;  %s161_s30 = scalar_lea.vmem (!%p736_p1), [#allocation2], %s326_s6 }
  0x4c   : > { %484 = dma.done.wait (%p737_p3), %s158_s8, 128  }
  0x4d   : > { %486 = vsyncadd (%p737_p3), %s158_s8, 4294967168  ;;  %s167_s3 = scalar_lea.sflag [#allocation6], %s675_s5  ;;  %s170_s7 = scalar_lea.vmem [#allocation5], %s326_s6 }
  0x4e   : > { %488 = dma.done.wait (%p737_p3), %s167_s3, 128  }
  0x4f   : > { %490 = vsyncadd (%p737_p3), %s167_s3, 4294967168  ;;  %v196_v0 = vld [vmem:[%s161_s30] sm:$0xff]  ;;  %v197_v1 = vld [vmem:[%s170_s7] sm:$0xff]  ;;  %s195_s29 = scalar_lea.vmem [#allocation7], %s326_s6  ;;  %s331_s28 = sshll.u32 %s550_s13, 7 }
  0x50   : > { %v198_v2 = vsub.f32 %v196_v0, %v197_v1  ;;  %s225_s14 = sshll.u32 %s195_s29, 4  ;;  %s223_s16 = scalar_lea.hbm %s725_s2, %s331_s28  ;;  %s226_s14 = int_to_ptr.vmem [resolvable:$true] %s225_s14 }
  0x51   : > { %s212_s17 = scalar_lea.sflag [#allocation4], %s675_s5  ;;  %s441_s24 = scalar_lea.vmem %s226_s14, 128 }
  0x52   : > { %v199_v3 = vand.u32 2147483647, %v198_v2  ;;  %v200_v4 = vmul.f32 %v198_v2, %v198_v2  ;;  %p442_p6 = scmp.ne.s32.totalorder %s226_s14, %s441_s24  ;;  %p738_p13 = scmp.ne.s32.totalorder %s730_s21, 0 }
  0x53   : > { %s513_s19 = smov [#allocation7]  }
  0x54   : > { %v201_v5 = vmul.f32 0.3, %v199_v3  ;;  %v202_v6 = vmul.f32 0.4, %v200_v4  ;;  %vm204_vm0 = vcmp.lt.f32.partialorder %v199_v3, 1.0  ;;  %p443_p7 = pnand %p442_p6, %p738_p13  ;;  %s445_s25 = sshll.u32 %s513_s19, 4  ;;  %s446_s25 = int_to_ptr.vmem [resolvable:$false] %s445_s25 }
  0x55   : > { %v205_v7 = vmul.f32 0.15, %v200_v4  ;;  %s447_s23 = scalar_lea.vmem %s446_s25, 256  ;;  %p448_p10 = scmp.lt.s32.totalorder %s226_s14, %s446_s25 }
  0x56   : > { %v203_v8 = vadd.f32 %v202_v6, %v201_v5  ;;  %v329_v9 = vadd.f32 -0.15, %v201_v5  ;;  %p444_p8 = pneg %p443_p7  ;;  %p449_p2 = scmp.lt.s32.totalorder %s447_s23, %s441_s24 }
  0x58   : > { %v207_v10 = vsel %vm204_vm0, %v205_v7, %v329_v9  ;;  %p450_p4 = por %p449_p2, %p448_p10 }
  0x59   : > { %v208_v11 = vadd.f32 %v207_v10, %v203_v8 }
  0x5a   : > { %p451_p5 = pnand %p450_p4, %p444_p8 }
  0x5b   : > { %210 = vst [vmem:[%s195_s29] sm:$0xff] %v208_v11 }
  0x5c   : > { %454 = shalt.err (!%p451_p5)
}
  0x5d   : > { %s455_s13 = scalar_lea.hbm %s223_s16, 128  ;;  %s459_s5 = scalar_lea.hbm %s725_s2, 256 }
  0x5e   : > { %p456_p9 = scmp.ne.s32.totalorder %s223_s16, %s455_s13  ;;  %p460_p12 = scmp.lt.s32.totalorder %s223_s16, %s725_s2 }
  0x5f   : > { %p461_p1 = scmp.lt.s32.totalorder %s459_s5, %s455_s13 }
  0x60   : > { %p457_p0 = pnand %p456_p9, %p738_p13 }
  0x61   : > { %p462_p3 = por %p461_p1, %p460_p12 }
  0x62   : > { %p458_p11 = pneg %p457_p0 }
  0x64   : > { %p463_p6 = pnand %p462_p3, %p458_p11 }
  0x66   : > { %466 = shalt.err (!%p463_p6)
}
  0x67   : > { %338 = dma.vmem_to_hbm [thread:$0]  (%p738_p13), %s226_s14, 128, %s223_s16, %s212_s17  }
  0x68 PF: > { %s237_s30 = sand.u32 1, %s497_s9   ;;  %p739_p7 = scmp.ne.s32.totalorder %s731_s22, 0 }
  0x69   : > { %p740_p8 = scmp.ge.s32.totalorder %s509_s12, 2  ;;  %s238_s3 = scalar_lea.sflag [#allocation4], %s237_s30 }
  0x6b   : > { %p348_p10 = pnand %p740_p8, %p739_p7 }
  0x6d   : > { %p349_p2 = pneg %p348_p10 }
  0x6f   : > { %492 = dma.done.wait (%p349_p2), %s238_s3, 128  }
  0x70   : > { %494 = vsyncadd (%p349_p2), %s238_s3, 4294967168  ;;  %p18_p4 = scmp.ge.s32.totalorder %s554_s15, 4   ;;  %s741_s9 = smov %s501_s10 }
  0x71   : > { %s742_s10 = smov %s505_s11  ;;  %s743_s11 = smov %s566_s18 }
  0x72   : > { %s744_s12 = smov %s554_s15  ;;  %20 = sbr.rel (!%p18_p4) target bundleno = 7 (0x7), region = 86 }
  0x77   :  { %243 = vsyncpa [#allocation3], 1 }
  0x78   :  { %245 = vsyncpa [#allocation3 + $0x1], 1 }
  0x79   :  { %246 = vsyncpa [#allocation6], 1 }
  0x7a   :  { %248 = vsyncpa [#allocation6 + $0x1], 1 }
  0x7b   :  { %249 = vsyncpa [#allocation4], 1 }
  0x7c   :  { %251 = vsyncpa [#allocation4 + $0x1], 1 }

</bundles_post_ra>
